<compile_context>
chip_gen: v5e
topology: v5e:2x2
jax: 0.10.0
libtpu: 0.0.40
codegen_flags: <defaults>
</compile_context>

<pallas_src>
import math

import jax
import jax.numpy as jnp
from jax.experimental import pallas as pl
from jax.experimental.pallas import tpu as pltpu


def _make_arcface_kernel(s: float, m: float, block_c: int):
    cos_m = math.cos(m)
    sin_m = math.sin(m)
    th = math.cos(math.pi - m)
    mm = math.sin(math.pi - m) * m

    def kernel(tile_hit_ref, logits_ref, targets_ref, out_ref, m_sc, l_sc, t_sc):
        # tile_hit_ref: (n_bt, n_ct) int32 in SMEM (scalar prefetch)
        # logits_ref:   (Bt, Ct) f32/bf16; targets_ref: (Bt, 1) int32
        # out_ref:      (Bt, 1) f32; m_sc/l_sc/t_sc: (Bt, 1) f32 scratch
        i = pl.program_id(0)
        j = pl.program_id(1)

        @pl.when(j == 0)
        def _():
            m_sc[...] = jnp.full_like(m_sc, -jnp.inf)
            l_sc[...] = jnp.zeros_like(l_sc)
            t_sc[...] = jnp.zeros_like(t_sc)

        cos = logits_ref[...].astype(jnp.float32)          # upcast per tile

        def lse_update(z):
            # online logsumexp across class tiles
            tile_max = jnp.max(z, axis=-1, keepdims=True)
            m_new = jnp.maximum(m_sc[...], tile_max)
            alpha = jnp.exp(m_sc[...] - m_new)
            l_sc[...] = alpha * l_sc[...] + jnp.sum(
                jnp.exp(z - m_new), axis=-1, keepdims=True)
            m_sc[...] = m_new

        tile_has_target = tile_hit_ref[i, j] > 0

        @pl.when(tile_has_target)
        def _():
            # Margin math only on the target column (Bt x 1, not Bt x Ct).
            local_tgt = targets_ref[...] - j * block_c       # (Bt, 1)
            row_hit = jnp.logical_and(local_tgt >= 0, local_tgt < block_c)
            class_ids = jax.lax.broadcasted_iota(jnp.int32, cos.shape, 1)
            mask = class_ids == local_tgt                    # (Bt, Ct)

            cos_t = jnp.sum(jnp.where(mask, cos, 0.0), axis=-1, keepdims=True)
            sin_t = jnp.sqrt(1.0 - cos_t * cos_t)            # NaN if |cos_t|>1 (torch)
            phi_t = cos_t * cos_m - sin_t * sin_m
            phi_t = jnp.where(cos_t > th, phi_t, cos_t - mm)  # easy_margin=False
            adj_t = s * phi_t                                 # (Bt, 1)

            # One pass over the tile: select margin-adjusted target, scale rest.
            z = jnp.where(mask, adj_t, cos * s)
            lse_update(z)
            # Accumulate the adjusted target logit; one class tile per row hits.
            t_sc[...] = t_sc[...] + jnp.where(row_hit, adj_t, 0.0)

        @pl.when(jnp.logical_not(tile_has_target))
        def _():
            # No row's target lands in this class tile: plain scaled-logit LSE.
            lse_update(cos * s)

        @pl.when(j == pl.num_programs(1) - 1)
        def _():
            # per-sample CE loss = logsumexp(out) - out[target]
            out_ref[...] = (m_sc[...] + jnp.log(l_sc[...])) - t_sc[...]

    return kernel


def _default_vmem_limit_bytes() -> int:
    """~3/4 of physical VMEM: 96 MiB on v5e/v6e (128 MiB), 48 MiB on v7x (64 MiB)."""
    cap = 64 * 1024 * 1024  # conservative fallback (v7x per-TC)
    try:
        cap = int(pltpu.get_tpu_info().vmem_capacity_bytes)
    except Exception:
        pass
    return min((cap * 3) // 4, 96 * 1024 * 1024)


def _pick_block_b(B: int, itemsize: int) -> int:
    # >= 16 sublanes for sub-32-bit dtypes (packing); keep >= 2 batch tiles so
    # the "parallel" batch axis shards across v7x's two TensorCores.
    min_b = 16 if itemsize < 4 else 8
    cap = B // 2 if B // 2 >= min_b else B
    for p in (512, 256, 128, 64, 32, 16, 8):
        if min_b <= p <= cap and B % p == 0:
            return p
    return B


def _pick_block_c(C: int, block_b: int, itemsize: int, budget_bytes: int) -> int:
    # Largest class tile whose double-buffered logits stream fits the budget.
    for p in (8192, 4096, 2048, 1024, 512, 256, 128):
        if p <= C and C % p == 0 and 2 * block_b * p * itemsize <= budget_bytes:
            return p
    return C  # small / indivisible C: full dimension (always legal)


def arcface_loss(logits, targets, *, num_classes: int | None = None,
                 s: float = 64.0, m: float = 0.5,
                 block_b: int | None = None, block_c: int | None = None,
                 vmem_limit_bytes: int | None = None):
    """logits: (B, num_classes) f32/bf16 cosines; targets: (B,) int. Scalar f32 loss."""
    assert 0.0 <= m <= math.pi / 2
    B, C = logits.shape
    if num_classes is not None:
        assert C == num_classes

    if vmem_limit_bytes is None:
        vmem_limit_bytes = _default_vmem_limit_bytes()
    itemsize = jnp.dtype(logits.dtype).itemsize

    if block_b is None:
        block_b = _pick_block_b(B, itemsize)
    if block_c is None:
        # leave ~40% of the scoped VMEM for scratch / pipelining headroom
        block_c = _pick_block_c(C, block_b, itemsize, int(vmem_limit_bytes * 0.6))
    assert B % block_b == 0 and C % block_c == 0

    n_bt = B // block_b
    n_ct = C // block_c

    targets_i32 = targets.astype(jnp.int32)
    targets_2d = targets_i32.reshape(B, 1)

    # Per-(batch tile, class tile) hit map, scalar-prefetched into SMEM so the
    # kernel can skip the mask/margin path on class tiles with no targets.
    row_tile = jnp.arange(B, dtype=jnp.int32) // block_b
    col_tile = targets_i32 // block_c
    tile_hit = jnp.zeros((n_bt, n_ct), jnp.int32).at[row_tile, col_tile].add(1)

    kernel = _make_arcface_kernel(s, m, block_c)

    cost = pl.CostEstimate(
        flops=10 * B * C,
        transcendentals=B * C,                       # exp per element
        bytes_accessed=B * C * itemsize + 3 * B * 4,
    )

    per_sample = pl.pallas_call(
        kernel,
        out_shape=jax.ShapeDtypeStruct((B, 1), jnp.float32),
        grid_spec=pltpu.PrefetchScalarGridSpec(
            num_scalar_prefetch=1,
            grid=(n_bt, n_ct),
            in_specs=[
                pl.BlockSpec((block_b, block_c), lambda i, j, hit: (i, j)),
                pl.BlockSpec((block_b, 1), lambda i, j, hit: (i, 0)),
            ],
            out_specs=pl.BlockSpec((block_b, 1), lambda i, j, hit: (i, 0)),
            scratch_shapes=[
                pltpu.VMEM((block_b, 1), jnp.float32),   # running max
                pltpu.VMEM((block_b, 1), jnp.float32),   # running exp-sum
                pltpu.VMEM((block_b, 1), jnp.float32),   # target logit accumulator
            ],
        ),
        compiler_params=pltpu.CompilerParams(
            dimension_semantics=("parallel", "arbitrary"),
            vmem_limit_bytes=int(vmem_limit_bytes),
        ),
        cost_estimate=cost,
    )(tile_hit, logits, targets_2d)

    # CrossEntropyLoss mean reduction done in the wrapper so the batch grid
    # axis stays parallel (no shared (1,1) accumulator across cores).
    return jnp.mean(per_sample)


if __name__ == "__main__":
    B, NUM_CLASSES = 16, 512
    key = jax.random.PRNGKey(0)
    k_logits, k_targets = jax.random.split(key)

    # logits are cosine similarities in (-1, 1)
    logits = jax.random.uniform(
        k_logits, (B, NUM_CLASSES), dtype=jnp.float32, minval=-0.99, maxval=0.99
    )
    targets = jax.random.randint(k_targets, (B,), 0, NUM_CLASSES, dtype=jnp.int32)

    s_, m_ = 64.0, 0.5

    def reference(lg, tg):
        # Pure-JAX reference of the original (untiled) torch math.
        cos_m, sin_m = math.cos(m_), math.sin(m_)
        th, mm = math.cos(math.pi - m_), math.sin(math.pi - m_) * m_
        cp = lg.astype(jnp.float32)
        sp = jnp.sqrt(1.0 - cp * cp)
        cpm = jnp.where(cp > th, cp * cos_m - sp * sin_m, cp - mm)
        oh = jax.nn.one_hot(tg, NUM_CLASSES, dtype=jnp.float32)
        out = (oh * cpm + (1.0 - oh) * cp) * s_
        return jnp.mean(jax.nn.logsumexp(out, axis=-1) - jnp.sum(oh * out, axis=-1))

    ref = reference(logits, targets)

    # 1) Small explicit tiles -> 2x4 grid; exercises both hit and no-hit tiles.
    loss = arcface_loss(
        logits, targets, num_classes=NUM_CLASSES, s=s_, m=m_,
        block_b=8, block_c=128,
    )
    jax.block_until_ready(loss)
    assert jnp.allclose(loss, ref, rtol=1e-4, atol=1e-4), (loss, ref)

    # 2) Auto-picked tiles (budget-aware block sizing).
    loss_auto = arcface_loss(logits, targets, num_classes=NUM_CLASSES, s=s_, m=m_)
    jax.block_until_ready(loss_auto)
    assert jnp.allclose(loss_auto, ref, rtol=1e-4, atol=1e-4), (loss_auto, ref)

    # 3) bf16 logits (halved HBM traffic); compare against a reference that
    #    sees the same bf16-quantized cosines so the tolerance stays tight.
    logits_bf16 = logits.astype(jnp.bfloat16)
    loss_bf16 = arcface_loss(
        logits_bf16, targets, num_classes=NUM_CLASSES, s=s_, m=m_,
        block_b=16, block_c=128,
    )
    jax.block_until_ready(loss_bf16)
    ref_bf16 = reference(logits_bf16.astype(jnp.float32), targets)
    assert jnp.allclose(loss_bf16, ref_bf16, rtol=1e-4, atol=1e-4), (loss_bf16, ref_bf16)

    print("KERNEL_OK")
</pallas_src>

<mosaic_0001>
module attributes {stable_mosaic.version = 11 : i64} {
  func.func @kernel(%arg0: i32, %arg1: i32, %arg2: memref<2x4xi32, #tpu.memory_space<smem>>, %arg3: memref<8x128xf32, #tpu.memory_space<vmem>>, %arg4: memref<8x1xi32, #tpu.memory_space<vmem>>, %arg5: memref<8x1xf32, #tpu.memory_space<vmem>>, %arg6: memref<8x1xf32, #tpu.memory_space<vmem>>, %arg7: memref<8x1xf32, #tpu.memory_space<vmem>>, %arg8: memref<8x1xf32, #tpu.memory_space<vmem>>) attributes {dimension_semantics = [#tpu.dimension_semantics<parallel>, #tpu.dimension_semantics<arbitrary>], iteration_bounds = array<i64: 2, 4>, scalar_prefetch = 1 : i64, scratch_operands = 3 : i64, tpu.core_type = #tpu.core_type<tc>, window_params = [{transform_indices = @transform_0, window_bounds = array<i64: 8, 128>}, {transform_indices = @transform_1, window_bounds = array<i64: 8, 1>}, {transform_indices = @transform_2, window_bounds = array<i64: 8, 1>}]} {
    %c0_i32 = arith.constant 0 : i32
    %0 = arith.cmpi eq, %arg1, %c0_i32 : i32
    %1 = arith.extui %0 : i1 to i32
    %c0_i32_0 = arith.constant 0 : i32
    %2 = arith.cmpi ne, %1, %c0_i32_0 : i32
    scf.if %2 {
      %cst = arith.constant 0xFF800000 : f32
      %16 = vector.broadcast %cst : f32 to vector<8x1xf32>
      %c0_6 = arith.constant 0 : index
      %c0_7 = arith.constant 0 : index
      %17 = vector.load %arg6[%c0_6, %c0_7] : memref<8x1xf32, #tpu.memory_space<vmem>>, vector<8x1xf32>
      tpu.vector_store %arg6[%c0_6, %c0_7], %16 {strides = array<i32>} : memref<8x1xf32, #tpu.memory_space<vmem>>, vector<8x1xf32>,
      %cst_8 = arith.constant 0.000000e+00 : f32
      %18 = vector.broadcast %cst_8 : f32 to vector<8x1xf32>
      %c0_9 = arith.constant 0 : index
      %c0_10 = arith.constant 0 : index
      %19 = vector.load %arg7[%c0_9, %c0_10] : memref<8x1xf32, #tpu.memory_space<vmem>>, vector<8x1xf32>
      tpu.vector_store %arg7[%c0_9, %c0_10], %18 {strides = array<i32>} : memref<8x1xf32, #tpu.memory_space<vmem>>, vector<8x1xf32>,
      %cst_11 = arith.constant 0.000000e+00 : f32
      %20 = vector.broadcast %cst_11 : f32 to vector<8x1xf32>
      %c0_12 = arith.constant 0 : index
      %c0_13 = arith.constant 0 : index
      %21 = vector.load %arg8[%c0_12, %c0_13] : memref<8x1xf32, #tpu.memory_space<vmem>>, vector<8x1xf32>
      tpu.vector_store %arg8[%c0_12, %c0_13], %20 {strides = array<i32>} : memref<8x1xf32, #tpu.memory_space<vmem>>, vector<8x1xf32>,
    } else {
    }
    %c0 = arith.constant 0 : index
    %c0_1 = arith.constant 0 : index
    %3 = vector.load %arg3[%c0, %c0_1] : memref<8x128xf32, #tpu.memory_space<vmem>>, vector<8x128xf32>
    %4 = arith.index_cast %arg0 : i32 to index
    %5 = arith.index_cast %arg1 : i32 to index
    %6 = memref.load %arg2[%4, %5] : memref<2x4xi32, #tpu.memory_space<smem>>
    %c0_i32_2 = arith.constant 0 : i32
    %7 = arith.cmpi sgt, %6, %c0_i32_2 : i32
    %8 = arith.extui %7 : i1 to i32
    %c0_i32_3 = arith.constant 0 : i32
    %9 = arith.cmpi ne, %8, %c0_i32_3 : i32
    scf.if %9 {
      %c0_6 = arith.constant 0 : index
      %c0_7 = arith.constant 0 : index
      %16 = vector.load %arg4[%c0_6, %c0_7] : memref<8x1xi32, #tpu.memory_space<vmem>>, vector<8x1xi32>
      %c128_i32 = arith.constant 128 : i32
      %17 = arith.muli %arg1, %c128_i32 : i32
      %18 = vector.broadcast %17 : i32 to vector<8x1xi32>
      %19 = arith.subi %16, %18 : vector<8x1xi32>
      %c0_i32_8 = arith.constant 0 : i32
      %20 = vector.broadcast %c0_i32_8 : i32 to vector<8x1xi32>
      %21 = arith.cmpi sge, %19, %20 : vector<8x1xi32>
      %c128_i32_9 = arith.constant 128 : i32
      %22 = vector.broadcast %c128_i32_9 : i32 to vector<8x1xi32>
      %23 = arith.cmpi slt, %19, %22 : vector<8x1xi32>
      %24 = arith.andi %21, %23 : vector<8x1xi1>
      %25 = tpu.iota {dimensions = array<i32: 1>} : vector<8x128xi32>
      %26 = vector.broadcast %19 : vector<8x1xi32> to vector<8x128xi32>
      %27 = arith.cmpi eq, %25, %26 : vector<8x128xi32>
      %cst = arith.constant 0.000000e+00 : f32
      %28 = vector.broadcast %cst : f32 to vector<8x128xf32>
      %29 = arith.select %27, %3, %28 : vector<8x128xi1>, vector<8x128xf32>
      %cst_10 = arith.constant dense<0.000000e+00> : vector<8xf32>
      %30 = vector.multi_reduction <add>, %29, %cst_10 [1] : vector<8x128xf32> to vector<8xf32>
      %31 = vector.shape_cast %30 : vector<8xf32> to vector<8x1xf32>
      %32 = arith.mulf %31, %31 : vector<8x1xf32>
      %cst_11 = arith.constant 1.000000e+00 : f32
      %33 = vector.broadcast %cst_11 : f32 to vector<8x1xf32>
      %34 = arith.subf %33, %32 : vector<8x1xf32>
      %35 = math.sqrt %34 : vector<8x1xf32>
      %cst_12 = arith.constant 0.87758255 : f32
      %36 = vector.broadcast %cst_12 : f32 to vector<8x1xf32>
      %37 = arith.mulf %31, %36 : vector<8x1xf32>
      %cst_13 = arith.constant 0.47942555 : f32
      %38 = vector.broadcast %cst_13 : f32 to vector<8x1xf32>
      %39 = arith.mulf %35, %38 : vector<8x1xf32>
      %40 = arith.subf %37, %39 : vector<8x1xf32>
      %cst_14 = arith.constant -0.87758255 : f32
      %41 = vector.broadcast %cst_14 : f32 to vector<8x1xf32>
      %42 = arith.cmpf ogt, %31, %41 : vector<8x1xf32>
      %cst_15 = arith.constant 0.239712775 : f32
      %43 = vector.broadcast %cst_15 : f32 to vector<8x1xf32>
      %44 = arith.subf %31, %43 : vector<8x1xf32>
      %45 = arith.select %42, %40, %44 : vector<8x1xi1>, vector<8x1xf32>
      %cst_16 = arith.constant 6.400000e+01 : f32
      %46 = vector.broadcast %cst_16 : f32 to vector<8x1xf32>
      %47 = arith.mulf %46, %45 : vector<8x1xf32>
      %cst_17 = arith.constant 6.400000e+01 : f32
      %48 = vector.broadcast %cst_17 : f32 to vector<8x128xf32>
      %49 = arith.mulf %3, %48 : vector<8x128xf32>
      %50 = vector.shape_cast %47 : vector<8x1xf32> to vector<8x1xf32>
      %51 = vector.broadcast %50 : vector<8x1xf32> to vector<8x128xf32>
      %52 = arith.select %27, %51, %49 : vector<8x128xi1>, vector<8x128xf32>
      %cst_18 = arith.constant dense<0xFF800000> : vector<8xf32>
      %53 = vector.multi_reduction <maximumf>, %52, %cst_18 [1] : vector<8x128xf32> to vector<8xf32>
      %54 = vector.shape_cast %53 : vector<8xf32> to vector<8x1xf32>
      %c0_19 = arith.constant 0 : index
      %c0_20 = arith.constant 0 : index
      %55 = vector.load %arg6[%c0_19, %c0_20] : memref<8x1xf32, #tpu.memory_space<vmem>>, vector<8x1xf32>
      %56 = arith.maximumf %55, %54 : vector<8x1xf32>
      %c0_21 = arith.constant 0 : index
      %c0_22 = arith.constant 0 : index
      %57 = vector.load %arg6[%c0_21, %c0_22] : memref<8x1xf32, #tpu.memory_space<vmem>>, vector<8x1xf32>
      %58 = arith.subf %57, %56 : vector<8x1xf32>
      %59 = math.exp %58 : vector<8x1xf32>
      %c0_23 = arith.constant 0 : index
      %c0_24 = arith.constant 0 : index
      %60 = vector.load %arg7[%c0_23, %c0_24] : memref<8x1xf32, #tpu.memory_space<vmem>>, vector<8x1xf32>
      %61 = arith.mulf %59, %60 : vector<8x1xf32>
      %62 = vector.broadcast %56 : vector<8x1xf32> to vector<8x128xf32>
      %63 = arith.subf %52, %62 : vector<8x128xf32>
      %64 = math.exp %63 : vector<8x128xf32>
      %cst_25 = arith.constant dense<0.000000e+00> : vector<8xf32>
      %65 = vector.multi_reduction <add>, %64, %cst_25 [1] : vector<8x128xf32> to vector<8xf32>
      %66 = vector.shape_cast %65 : vector<8xf32> to vector<8x1xf32>
      %67 = arith.addf %61, %66 : vector<8x1xf32>
      %c0_26 = arith.constant 0 : index
      %c0_27 = arith.constant 0 : index
      %68 = vector.load %arg7[%c0_26, %c0_27] : memref<8x1xf32, #tpu.memory_space<vmem>>, vector<8x1xf32>
      tpu.vector_store %arg7[%c0_26, %c0_27], %67 {strides = array<i32>} : memref<8x1xf32, #tpu.memory_space<vmem>>, vector<8x1xf32>,
      %c0_28 = arith.constant 0 : index
      %c0_29 = arith.constant 0 : index
      %69 = vector.load %arg6[%c0_28, %c0_29] : memref<8x1xf32, #tpu.memory_space<vmem>>, vector<8x1xf32>
      tpu.vector_store %arg6[%c0_28, %c0_29], %56 {strides = array<i32>} : memref<8x1xf32, #tpu.memory_space<vmem>>, vector<8x1xf32>,
      %c0_30 = arith.constant 0 : index
      %c0_31 = arith.constant 0 : index
      %70 = vector.load %arg8[%c0_30, %c0_31] : memref<8x1xf32, #tpu.memory_space<vmem>>, vector<8x1xf32>
      %cst_32 = arith.constant 0.000000e+00 : f32
      %71 = vector.broadcast %cst_32 : f32 to vector<8x1xf32>
      %72 = arith.select %24, %47, %71 : vector<8x1xi1>, vector<8x1xf32>
      %73 = arith.addf %70, %72 : vector<8x1xf32>
      %c0_33 = arith.constant 0 : index
      %c0_34 = arith.constant 0 : index
      %74 = vector.load %arg8[%c0_33, %c0_34] : memref<8x1xf32, #tpu.memory_space<vmem>>, vector<8x1xf32>
      tpu.vector_store %arg8[%c0_33, %c0_34], %73 {strides = array<i32>} : memref<8x1xf32, #tpu.memory_space<vmem>>, vector<8x1xf32>,
    } else {
    }
    %true = arith.constant true
    %10 = arith.xori %7, %true : i1
    %11 = arith.extui %10 : i1 to i32
    %c0_i32_4 = arith.constant 0 : i32
    %12 = arith.cmpi ne, %11, %c0_i32_4 : i32
    scf.if %12 {
      %cst = arith.constant 6.400000e+01 : f32
      %16 = vector.broadcast %cst : f32 to vector<8x128xf32>
      %17 = arith.mulf %3, %16 : vector<8x128xf32>
      %cst_6 = arith.constant dense<0xFF800000> : vector<8xf32>
      %18 = vector.multi_reduction <maximumf>, %17, %cst_6 [1] : vector<8x128xf32> to vector<8xf32>
      %19 = vector.shape_cast %18 : vector<8xf32> to vector<8x1xf32>
      %c0_7 = arith.constant 0 : index
      %c0_8 = arith.constant 0 : index
      %20 = vector.load %arg6[%c0_7, %c0_8] : memref<8x1xf32, #tpu.memory_space<vmem>>, vector<8x1xf32>
      %21 = arith.maximumf %20, %19 : vector<8x1xf32>
      %c0_9 = arith.constant 0 : index
      %c0_10 = arith.constant 0 : index
      %22 = vector.load %arg6[%c0_9, %c0_10] : memref<8x1xf32, #tpu.memory_space<vmem>>, vector<8x1xf32>
      %23 = arith.subf %22, %21 : vector<8x1xf32>
      %24 = math.exp %23 : vector<8x1xf32>
      %c0_11 = arith.constant 0 : index
      %c0_12 = arith.constant 0 : index
      %25 = vector.load %arg7[%c0_11, %c0_12] : memref<8x1xf32, #tpu.memory_space<vmem>>, vector<8x1xf32>
      %26 = arith.mulf %24, %25 : vector<8x1xf32>
      %27 = vector.broadcast %21 : vector<8x1xf32> to vector<8x128xf32>
      %28 = arith.subf %17, %27 : vector<8x128xf32>
      %29 = math.exp %28 : vector<8x128xf32>
      %cst_13 = arith.constant dense<0.000000e+00> : vector<8xf32>
      %30 = vector.multi_reduction <add>, %29, %cst_13 [1] : vector<8x128xf32> to vector<8xf32>
      %31 = vector.shape_cast %30 : vector<8xf32> to vector<8x1xf32>
      %32 = arith.addf %26, %31 : vector<8x1xf32>
      %c0_14 = arith.constant 0 : index
      %c0_15 = arith.constant 0 : index
      %33 = vector.load %arg7[%c0_14, %c0_15] : memref<8x1xf32, #tpu.memory_space<vmem>>, vector<8x1xf32>
      tpu.vector_store %arg7[%c0_14, %c0_15], %32 {strides = array<i32>} : memref<8x1xf32, #tpu.memory_space<vmem>>, vector<8x1xf32>,
      %c0_16 = arith.constant 0 : index
      %c0_17 = arith.constant 0 : index
      %34 = vector.load %arg6[%c0_16, %c0_17] : memref<8x1xf32, #tpu.memory_space<vmem>>, vector<8x1xf32>
      tpu.vector_store %arg6[%c0_16, %c0_17], %21 {strides = array<i32>} : memref<8x1xf32, #tpu.memory_space<vmem>>, vector<8x1xf32>,
    } else {
    }
    %c3_i32 = arith.constant 3 : i32
    %13 = arith.cmpi eq, %arg1, %c3_i32 : i32
    %14 = arith.extui %13 : i1 to i32
    %c0_i32_5 = arith.constant 0 : i32
    %15 = arith.cmpi ne, %14, %c0_i32_5 : i32
    scf.if %15 {
      %c0_6 = arith.constant 0 : index
      %c0_7 = arith.constant 0 : index
      %16 = vector.load %arg6[%c0_6, %c0_7] : memref<8x1xf32, #tpu.memory_space<vmem>>, vector<8x1xf32>
      %c0_8 = arith.constant 0 : index
      %c0_9 = arith.constant 0 : index
      %17 = vector.load %arg7[%c0_8, %c0_9] : memref<8x1xf32, #tpu.memory_space<vmem>>, vector<8x1xf32>
      %18 = math.log %17 : vector<8x1xf32>
      %19 = arith.addf %16, %18 : vector<8x1xf32>
      %c0_10 = arith.constant 0 : index
      %c0_11 = arith.constant 0 : index
      %20 = vector.load %arg8[%c0_10, %c0_11] : memref<8x1xf32, #tpu.memory_space<vmem>>, vector<8x1xf32>
      %21 = arith.subf %19, %20 : vector<8x1xf32>
      %c0_12 = arith.constant 0 : index
      %c0_13 = arith.constant 0 : index
      %22 = vector.load %arg5[%c0_12, %c0_13] : memref<8x1xf32, #tpu.memory_space<vmem>>, vector<8x1xf32>
      tpu.vector_store %arg5[%c0_12, %c0_13], %21 {strides = array<i32>} : memref<8x1xf32, #tpu.memory_space<vmem>>, vector<8x1xf32>,
    } else {
    }
    return
  }
  func.func @transform_0(%arg0: i32, %arg1: i32, %arg2: memref<2x4xi32, #tpu.memory_space<smem>>) -> (i32, i32) {
    %c0_i32 = arith.constant 0 : i32
    return %arg0, %arg1 : i32, i32
  }
  func.func @transform_1(%arg0: i32, %arg1: i32, %arg2: memref<2x4xi32, #tpu.memory_space<smem>>) -> (i32, i32) {
    %c0_i32 = arith.constant 0 : i32
    %c0_i32_0 = arith.constant 0 : i32
    return %arg0, %c0_i32 : i32, i32
  }
  func.func @transform_2(%arg0: i32, %arg1: i32, %arg2: memref<2x4xi32, #tpu.memory_space<smem>>) -> (i32, i32) {
    %c0_i32 = arith.constant 0 : i32
    %c0_i32_0 = arith.constant 0 : i32
    return %arg0, %c0_i32 : i32, i32
  }
}

</mosaic_0001>

<bundles_post_ra>
// kernel: tpu_custom_call.1
= control target key start
LH: loop header
LB: loop body
LE: loop exit
PB: predicated region body
PF: predicated region fallthrough
CT: control target
= control target key end

     0   :  { %s644_s15 = smov [#allocation6]   ;;  %s813_s0 = inlined_call_operand.vmem [shape: s32[2,4], index: 0, kind: input, shape index: {}]   ;;  %s814_s1 = inlined_call_operand.hbm [shape: f32[16,512], index: 1, kind: input, shape index: {}]   ;;  %s815_s2 = inlined_call_operand.vmem [shape: s32[16,1], index: 2, kind: input, shape index: {}]   ;;  %s816_s3 = inlined_call_operand.vmem [shape: f32[16,1], index: 3, kind: output, shape index: {}]  }
   0x1   :  { %s9_s14 = sshll.u32 %s813_s0, 4  ;;  %s10_s14 = int_to_ptr.vmem [resolvable:$true] %s9_s14 }
   0x2   :  { %12 = dma.vmem_to_smem %s10_s14, 32, %s644_s15, [#allocation5] }
   0x3   :  { %606 = dma.done.wait [#allocation5], 32 }
   0x4   :  { %607 = vsyncadd [#allocation5], 4294967264 }
   0x5   :  { %15 = sfence }
   0x6   :  { %16 = vsyncpa [#allocation8], 0 }
   0x7   :  { %18 = vsyncpa [#allocation8 + $0x1], 0  ;;  %s672_s16 = smov 0   ;;  %s674_s17 = smov 0  }
   0x8   :  { %s676_s18 = smov 0   ;;  %s678_s19 = smov 0  }
   0x9   :  { %s680_s20 = smov 0   ;;  %s682_s21 = smov 0  }
   0xa   :  { %s684_s0 = smov 0   ;;  %s686_s22 = smov 0  }
   0xb LB: > { %s421_s23 = sadd.s32 4294967295, %s642_s22   ;;  %s33_s24 = sadd.s32 1, %s634_s21  ;;  %s642_s22 = sphi %s686_s22, %s24_s22   ;;  %s638_s0 = sphi %s684_s0, %s825_s0   ;;  %s634_s21 = sphi %s682_s21, %s824_s21   ;;  %s630_s20 = sphi %s680_s20, %s823_s20   ;;  %s626_s19 = sphi %s678_s19, %s822_s19   ;;  %s622_s18 = sphi %s676_s18, %s821_s18   ;;  %s618_s17 = sphi %s674_s17, %s820_s17   ;;  %s614_s16 = sphi %s672_s16, %s819_s16  }
   0xc   : > { %p34_p0 = scmp.ge.s32.totalorder %s33_s24, 4  ;;  %s36_s25 = sadd.s32 1, %s638_s0 }
   0xd   : > { %s45_s26 = sadd.s32 1, %s622_s18  ;;  %p52_p1 = scmp.ne.s32.totalorder %s622_s18, %s618_s17 }
   0xe   : > { %s827_s24 = smov (%p34_p0, %s33_s24), 0  ;;  %s829_s25 = smov (!%p34_p0, %s36_s25), %s638_s0 }
   0xf   : > { %s41_s27 = ssub.s32 %s634_s21, %s827_s24  ;;  %p53_p2 = scmp.eq.s32.totalorder %s642_s22, 0 }
  0x10   : > { %p38_p3 = scmp.ge.s32.totalorder %s829_s25, 2  ;;  %p58_p4 = scmp.ne.s32.totalorder %s618_s17, %s614_s16 }
  0x11   : > { %p723_p5 = por %p53_p2, %p52_p1  ;;  %p59_p6 = scmp.eq.s32.totalorder %s421_s23, 0 }
  0x12   : > { %s831_s25 = smov (%p38_p3, %s829_s25), 0  ;;  %p447_p8 = scmp.lt.s32.totalorder %s642_s22, 8 }
  0x13   : > { %p729_p7 = por %p59_p6, %p58_p4  ;;  %s40_s30 = ssub.s32 %s638_s0, %s831_s25 }
  0x14   : > { %s42_s4 = sor.u32 %s41_s27, %s40_s30  ;;  %s134_s5 = sand.u32 1, %s622_s18  }
  0x15   : > { %p43_p9 = scmp.eq.s32.totalorder %s42_s4, 0  ;;  %s425_s6 = sshll.u32 %s134_s5, 3 }
  0x16   : > { %s426_s7 = sshll.u32 %s638_s0, 2  ;;  %s138_s11 = scalar_lea.vmem [#allocation7], %s425_s6 }
  0x17   : > { %s739_s8 = scalar_select %p43_p9, %s622_s18, %s45_s26  }
  0x18   : > { %s142_s9 = sadd.s32 %s634_s21, %s426_s7  ;;  %s148_s12 = sshll.u32 %s138_s11, 4  ;;  %s149_s12 = int_to_ptr.vmem [resolvable:$true] %s148_s12 }
  0x19   : > { %s427_s10 = sshll.u32 %s142_s9, 3  ;;  %p444_p10 = pnand %p447_p8, %p723_p5 }
  0x1a   : > { %s144_s15 = scalar_lea.hbm %s814_s1, %s427_s10  ;;  %p428_p11 = scmp.ge.s32.totalorder %s642_s22, 1 }
  0x1b   : > { %s146_s16 = sshll.u32 %s144_s15, 4  ;;  %p160_p12 = scmp.lt.s32.totalorder %s642_s22, 9  ;;  %s147_s16 = int_to_ptr.hbm [resolvable:$true] %s146_s16 }
  0x1c   : > { %s135_s23 = scalar_lea.sflag [#allocation8], %s134_s5 }
  0x1d   : > { %446 = dma.hbm_to_vmem [thread:$0]  (!%p444_p10), %s147_s16, 128, %s149_s12, %s135_s23  }
  0x1e   : > { %p161_p13 = pnand %p428_p11, %p160_p12 }
  0x1f   : > { %s166_s26 = sand.u32 (!%p161_p13), 1, %s618_s17  }
  0x20   : > { %164 = sbr.rel (%p161_p13) target bundleno = 1093 (0x445), region = 28  ;;  %s429_s27 = sshll.u32 (!%p161_p13), %s166_s26, 3 }
  0x21   : > { %s167_s30 = scalar_lea.sflag (!%p161_p13), [#allocation8], %s166_s26  ;;  %s170_s4 = scalar_lea.vmem (!%p161_p13), [#allocation7], %s429_s27 }
  0x25   : > { %609 = dma.done.wait (%p729_p7), %s167_s30, 128  }
  0x26   : > { %611 = vsyncadd (%p729_p7), %s167_s30, 4294967168  ;;  %p195_p0 = scmp.lt.s32.totalorder %s630_s20, 1  ;;  %p432_p1 = scmp.ne.s32.totalorder %s626_s19, 0 }
  0x28   : > { %s196_s28 = scalar_select %p195_p0, %s630_s20, 1 }
  0x29   : > { %206 = sbr.rel (%p432_p1) target bundleno = 50 (0x32), region = 36 }
  0x2a   : > { %s430_s6 = sshll.u32 %s196_s28, 3 }
  0x2b   : > { %s198_s9 = scalar_lea.vmem %s815_s2, %s430_s6  ;;  %s764_s12 = scalar_lea.vmem %s816_s3, %s430_s6 }
  0x2e   : > { %vm207_vm0 = vcmask 7168   ;;  %v645_v0 = vmov -inf   ;;  %v646_v1 = vmov 0.0  }
  0x2f   : > { %208 = vst.msk [vmem:[#allocation2] sm:$0xff] %vm207_vm0, %v645_v0 }
  0x30   : > { %209 = vst.msk [vmem:[#allocation3] sm:$0xff] %vm207_vm0, %v646_v1 }
  0x31   : > { %210 = vst.msk [vmem:[#allocation4] sm:$0xff] %vm207_vm0, %v646_v1 }
  0x32 PF: > { %v767_v2 = vld [vmem:[%s170_s4] sm:$0xff]  ;;  %s212_s29 = sshra.s32 %s626_s19, 7  ;;  %s217_s13 = sand.u32 127, %s626_s19 }
  0x33   : > { %s214_s14 = sadd.s32 %s630_s20, %s212_s29 }
  0x34   : > { %s433_s15 = sshll.u32 %s214_s14, 7 }
  0x35   : > { %s218_s16 = sadd.s32 %s433_s15, %s217_s13 }
  0x36   : > { %s772_s23 = sld [smem:[#allocation6 + %s218_s16]] }
  0x3c   : > { %p434_p2 = scmp.le.s32.totalorder %s772_s23, 0 }
  0x3d   : > { %s435_s26 = sshll.u32 (!%p434_p2), %s626_s19, 7 }
  0x3e   : > { %223 = sbr.rel (%p434_p2) target bundleno = 699 (0x2bb), region = 40 }
  0x43   : > { %v224_v3 = vld [vmem:[%s198_s9] sm:$0xff]  ;;  %v647_v4 = vmov 0   ;;  %v226_v5 = vstv %s435_s26  ;;  %v231_v7 = vlaneseq  ;;  %v261_v28 = vmul.f32 64.0, %v767_v2  ;;  %v286_v31 = vld [vmem:[#allocation4] sm:$0xff]  ;;  %v270_v45 = vld [vmem:[#allocation3] sm:$0xff] }
  0x44   : > { %517 = vset.pattern.permute.xlu0 %v647_v4  ;;  %518 = vset.pattern.permute.xlu1 %v647_v4  ;;  %v227_v6 = vsub.s32 %v224_v3, %v226_v5  ;;  %vm283_vm8 = vcmask 7168   ;;  %v265_v35 = vld [vmem:[#allocation2] sm:$0xff] }
  0x45   : > { %v232_v8 = vand.u32 127, %v231_v7 }
  0x46   : > { %234 = vperm.xlu0 %517, %v227_v6   ;;  %vm228_vm4 = vcmp.ge.s32.totalorder %v227_v6, 0  ;;  %vm229_vm5 = vcmp.lt.s32.totalorder %v227_v6, 128 }
  0x47   : > { %vm230_vm7 = vmand %vm228_vm4, %vm229_vm5 }
  0xb8   : > { %v235_v9 = vpop.permute.xlu0 %234 }
  0xb9   : > { %vm236_vm1 = vcmp.eq.s32.totalorder %v232_v8, %v235_v9 }
  0xba   : > { %v237_v10 = vsel %vm236_vm1, %v767_v2, 0.0 }
  0xbb   : > { %238 = vadd.xlane.f32.xlu0 %v237_v10 }
 0x12e   : > { %v239_v11 = vpop.xlane.xlu0 %238 }
 0x12f   : > { %v240_v12 = vmul.f32 %v239_v11, %v239_v11  ;;  %v254_v24 = vmul.f32 0.87758255, %v239_v11  ;;  %v436_v27 = vadd.f32 -0.23971277, %v239_v11  ;;  %vm257_vm6 = vcmp.gt.f32.partialorder %v239_v11, -0.87758255 }
 0x131   : > { %v241_v13 = vsub.f32 1.0, %v240_v12 }
 0x133   : > { %519 = vrsqrt.f32 %v241_v13  ;;  %vm249_vm2 = vcmp.eq.f32.partialorder %v241_v13, inf  ;;  %v252_v21 = vand.u32 2147483648, %v241_v13  ;;  %vm251_vm3 = vcmp.eq.f32.partialorder %v241_v13, 0.0 }
 0x139   : > { %v520_v14 = vpop.eup %519 }
 0x13a   : > { %v243_v15 = vmul.f32 %v520_v14, %v241_v13 }
 0x13c   : > { %v244_v16 = vmul.f32 %v520_v14, %v243_v15 }
 0x13e   : > { %v245_v17 = vmul.f32 0.5, %v244_v16 }
 0x140   : > { %v246_v18 = vsub.f32 1.5, %v245_v17 }
 0x142   : > { %v247_v19 = vmul.f32 %v520_v14, %v246_v18 }
 0x144   : > { %v248_v20 = vmul.f32 %v247_v19, %v241_v13 }
 0x146   : > { %v250_v22 = vsel %vm249_vm2, %v241_v13, %v248_v20 }
 0x147   : > { %v253_v23 = vsel %vm251_vm3, %v252_v21, %v250_v22 }
 0x148   : > { %v255_v25 = vmul.f32 0.47942555, %v253_v23 }
 0x14a   : > { %v256_v26 = vsub.f32 %v254_v24, %v255_v25 }
 0x14c   : > { %v259_v29 = vsel %vm257_vm6, %v256_v26, %v436_v27 }
 0x14d   : > { %v260_v30 = vmul.f32 64.0, %v259_v29 }
 0x14f   : > { %v262_v32 = vsel %vm236_vm1, %v260_v30, %v261_v28  ;;  %v287_v33 = vsel %vm230_vm7, %v260_v30, 0.0 }
 0x150   : > { %263 = vmax.xlane.f32.xlu1 %v262_v32  ;;  %v288_v34 = vadd.f32 %v287_v33, %v286_v31 }
 0x152   : > { %289 = vst.msk [vmem:[#allocation4] sm:$0xff] %vm283_vm8, %v288_v34 }
 0x1c3   : > { %v264_v36 = vpop.xlane.xlu1 %263 }
 0x1c4   : > { %v266_v37 = vmax.f32 %v265_v35, %v264_v36 }
 0x1c6   : > { %v267_v38 = vsub.f32 %v265_v35, %v266_v37  ;;  %285 = vst.msk [vmem:[#allocation2] sm:$0xff] %vm283_vm8, %v266_v37  ;;  %274 = vperm.xlu1 %518, %v266_v37  }
 0x1c8   : > { %v268_v43 = vmul.f32 1.442695, %v267_v38 }
 0x238   : > { %v275_v39 = vpop.permute.xlu1 %274 }
 0x239   : > { %v277_v40 = vsub.f32 %v262_v32, %v275_v39 }
 0x23b   : > { %v278_v41 = vmul.f32 1.442695, %v277_v40 }
 0x23d   : > { %521 = vpow2.f32 %v278_v41 }
 0x23e   : > { %523 = vpow2.f32 %v268_v43 }
 0x243   : > { %v522_v42 = vpop.eup %521 }
 0x244   : > { %280 = vadd.xlane.f32.xlu2 %v522_v42  ;;  %v524_v44 = vpop.eup %523 }
 0x245   : > { %v271_v46 = vmul.f32 %v524_v44, %v270_v45 }
 0x2b7   : > { %v281_v47 = vpop.xlane.xlu2 %280 }
 0x2b8   : > { %v282_v48 = vadd.f32 %v281_v47, %v271_v46 }
 0x2ba   : > { %284 = vst.msk [vmem:[#allocation3] sm:$0xff] %vm283_vm8, %v282_v48 }
 0x2bb PF: > { %p437_p3 = scmp.gt.s32.totalorder %s772_s23, 0 }
 0x2bd   : > { %293 = sbr.rel (%p437_p3) target bundleno = 1071 (0x42f), region = 44 }
 0x2c2   : > { %v294_v49 = vmul.f32 64.0, %v767_v2  ;;  %v648_v50 = vmov 0   ;;  %v297_v51 = vld [vmem:[#allocation2] sm:$0xff]  ;;  %vm315_vm9 = vcmask 7168   ;;  %v302_v61 = vld [vmem:[#allocation3] sm:$0xff] }
 0x2c3   : > { %525 = vset.pattern.permute.xlu0 %v648_v50 }
 0x2c4   : > { %295 = vmax.xlane.f32.xlu0 %v294_v49 }
 0x337   : > { %v296_v52 = vpop.xlane.xlu0 %295 }
 0x338   : > { %v298_v53 = vmax.f32 %v297_v51, %v296_v52 }
 0x33a   : > { %v299_v54 = vsub.f32 %v297_v51, %v298_v53  ;;  %317 = vst.msk [vmem:[#allocation2] sm:$0xff] %vm315_vm9, %v298_v53  ;;  %306 = vperm.xlu0 %525, %v298_v53  }
 0x33c   : > { %v300_v59 = vmul.f32 1.442695, %v299_v54 }
 0x3ac   : > { %v307_v55 = vpop.permute.xlu0 %306 }
 0x3ad   : > { %v309_v56 = vsub.f32 %v294_v49, %v307_v55 }
 0x3af   : > { %v310_v57 = vmul.f32 1.442695, %v309_v56 }
 0x3b1   : > { %526 = vpow2.f32 %v310_v57 }
 0x3b2   : > { %528 = vpow2.f32 %v300_v59 }
 0x3b7   : > { %v527_v58 = vpop.eup %526 }
 0x3b8   : > { %312 = vadd.xlane.f32.xlu1 %v527_v58  ;;  %v529_v60 = vpop.eup %528 }
 0x3b9   : > { %v303_v62 = vmul.f32 %v529_v60, %v302_v61 }
 0x42b   : > { %v313_v63 = vpop.xlane.xlu1 %312 }
 0x42c   : > { %v314_v0 = vadd.f32 %v313_v63, %v303_v62 }
 0x42e   : > { %316 = vst.msk [vmem:[#allocation3] sm:$0xff] %vm315_vm9, %v314_v0 }
 0x42f PF: > { %p438_p4 = scmp.ne.s32.totalorder %s626_s19, 3 }
 0x431   : > { %321 = sbr.rel (%p438_p4) target bundleno = 1093 (0x445), region = 48 }
 0x436   : > { %v323_v1 = vld [vmem:[#allocation3] sm:$0xff]  ;;  %v322_v3 = vld [vmem:[#allocation2] sm:$0xff]  ;;  %v327_v5 = vld [vmem:[#allocation4] sm:$0xff]  ;;  %vm329_vm10 = vcmask 7168  }
 0x437   : > { %530 = vlog2.f32 %v323_v1 }
 0x43d   : > { %v531_v2 = vpop.eup %530 }
 0x43e   : > { %v325_v4 = vmul.f32 0.6931472, %v531_v2 }
 0x440   : > { %v326_v6 = vadd.f32 %v325_v4, %v322_v3 }
 0x442   : > { %v328_v7 = vsub.f32 %v326_v6, %v327_v5 }
 0x444   : > { %330 = vst.msk [vmem:[%s764_s12] sm:$0xff] %vm329_vm10, %v328_v7 }
 0x445 PF: > { %s24_s22 = sadd.s32 1, %s642_s22   ;;  %s819_s16 = smov %s618_s17 }
 0x446   : > { %p21_p5 = scmp.ge.s32.totalorder %s24_s22, 10   ;;  %s820_s17 = smov %s622_s18 }
 0x447   : > { %s821_s18 = smov %s739_s8  ;;  %s822_s19 = smov %s634_s21 }
 0x448   : > { %s823_s20 = smov %s638_s0  ;;  %s824_s21 = smov %s827_s24 }
 0x449   : > { %s825_s0 = smov %s831_s25  ;;  %23 = sbr.rel (!%p21_p5) target bundleno = 11 (0xb), region = 87 }
 0x44e   :  { %350 = vsyncpa [#allocation8], 1 }
 0x44f   :  { %352 = vsyncpa [#allocation8 + $0x1], 1 }

</bundles_post_ra>
